<compile_context>
chip_gen: v7x
topology: tpu7x:2x2x1
jax: 0.10.0
libtpu: 0.0.40
codegen_flags: <defaults>
</compile_context>

<pallas_src>
import math

import jax
import jax.numpy as jnp
from jax.experimental import pallas as pl
from jax.experimental.pallas import tpu as pltpu


def _round_up(x: int, m: int) -> int:
    return (x + m - 1) // m * m


def adaptive_pool_matrix(s: int, g: int) -> jnp.ndarray:
    """1-axis -> 2-axis adaptive average pooling matrix, shape (g*g, s*s).

    Matches torch.nn.AdaptiveAvgPool2d window semantics:
      window_i = [floor(i*s/g), ceil((i+1)*s/g))
    """
    i = jnp.arange(g)
    starts = (i * s) // g
    ends = -((-(i + 1) * s) // g)  # ceil((i+1)*s/g)
    idx = jnp.arange(s)
    mask = (idx[None, :] >= starts[:, None]) & (idx[None, :] < ends[:, None])
    row = mask.astype(jnp.float32)
    row = row / row.sum(axis=1, keepdims=True)          # (g, s) per-axis averaging
    # 2D pooling factorizes: P[(i,j),(h,w)] = row[i,h] * row[j,w]
    P = jnp.einsum("ih,jw->ijhw", row, row).reshape(g * g, s * s)
    return P


def pooling_proj_kernel(x_ref, p_ref, wt_ref, b_ref, o_ref, pooled_ref):
    # x_ref:      (Bt, l, dp)     batch tile of tokens, channels lane-padded
    # p_ref:      (g2, l)         pooling matrix
    # wt_ref:     (dp, op)        projection weight (transposed, padded)
    # b_ref:      (1, op)         bias (padded)
    # o_ref:      (Bt*g2, op)     lane-dense 2-D output slab
    # pooled_ref: (Bt*g2, dp)     f32 VMEM scratch
    bt = x_ref.shape[0]
    g2 = p_ref.shape[0]
    p = p_ref[...]

    # Pooling reduction on the MXU, one batch at a time (Bt is a static block
    # dim, so this loop unrolls).  Packing the results contiguously lets the
    # projection below run as ONE matmul with M = Bt*g2 (batch folded into M).
    for b in range(bt):
        pooled_ref[pl.ds(b * g2, g2), :] = jnp.dot(
            p, x_ref[b], preferred_element_type=jnp.float32)

    out = jnp.dot(pooled_ref[...].astype(wt_ref.dtype), wt_ref[...],
                  preferred_element_type=jnp.float32)
    out = out + b_ref[...].astype(jnp.float32)
    o_ref[...] = out.astype(o_ref.dtype)


def simple_pooling_forward(x, weight, bias, grid_size: int):
    """x: (bz, l, d); weight: (out_dim, d); bias: (out_dim,)."""
    bz, l, d = x.shape
    s = int(math.sqrt(l))
    assert s * s == l, "sequence length must be a perfect square"
    g2 = grid_size * grid_size
    out_dim = weight.shape[0]

    # Lane-dense padding of the channel dims (no-op for 128-multiple dims).
    dp = _round_up(d, 128)
    op = _round_up(out_dim, 128)
    x_p = x if dp == d else jnp.pad(x, ((0, 0), (0, 0), (0, dp - d)))
    wt = jnp.pad(weight.T.astype(x.dtype), ((0, dp - d), (0, op - out_dim)))
    b2 = jnp.pad(bias, (0, op - out_dim)).astype(x.dtype).reshape(1, op)
    P = adaptive_pool_matrix(s, grid_size).astype(x.dtype)

    # Batch tile: big enough to (a) keep the x block in the MiB range and
    # (b) push the projection's M = Bt*g2 towards >=128 -- but never more than
    # the batch.  For the demo shapes this puts the whole batch in one step.
    per_batch_bytes = l * dp * x.dtype.itemsize
    bt = min(bz, max(-(-128 // g2),
                     max(1, (2 * 1024 * 1024) // per_batch_bytes)))
    while bz % bt:
        bt -= 1
    if bt != bz and (bt * g2) % 8:
        bt = bz  # keep the output block sublane-aligned
    nb = bz // bt

    out2d = pl.pallas_call(
        pooling_proj_kernel,
        out_shape=jax.ShapeDtypeStruct((bz * g2, op), x.dtype),
        grid_spec=pltpu.PrefetchScalarGridSpec(
            num_scalar_prefetch=0,
            grid=(nb,),
            in_specs=[
                pl.BlockSpec((bt, l, dp), lambda i: (i, 0, 0)),
                # NOTE: P / wt / bias are grid-invariant; once wt is large
                # (real model dims) they should be single-buffered to free
                # VMEM for a bigger x block, and vmem_limit_bytes raised.
                pl.BlockSpec((g2, l), lambda i: (0, 0)),
                pl.BlockSpec((dp, op), lambda i: (0, 0)),
                pl.BlockSpec((1, op), lambda i: (0, 0)),
            ],
            out_specs=pl.BlockSpec((bt * g2, op), lambda i: (i, 0)),
            scratch_shapes=[pltpu.VMEM((bt * g2, dp), jnp.float32)],
        ),
        compiler_params=pltpu.CompilerParams(
            dimension_semantics=("parallel",),
        ),
    )(x_p, P, wt, b2)

    # Slice away the output padding and restore the (bz, g2, out_dim) shape.
    return out2d[:, :out_dim].reshape(bz, g2, out_dim)


def simple_pooling_reference(x, weight, bias, grid_size: int):
    """Pure-JAX reference mirroring the PyTorch forward."""
    bz, l, d = x.shape
    s = int(math.sqrt(l))
    P = adaptive_pool_matrix(s, grid_size)          # (g2, l)
    pooled = jnp.einsum("pl,bld->bpd", P, x)        # (bz, g2, d)
    return jnp.einsum("bpd,od->bpo", pooled, weight) + bias


if __name__ == "__main__":
    # Small shapes consistent with the module: tokens form an s x s grid.
    bz = 2
    s = 8
    l = s * s            # 64 tokens
    input_dim = 32
    output_dim = 32
    grid_size = 4

    key = jax.random.PRNGKey(0)
    kx, kw, kb = jax.random.split(key, 3)

    x = jax.random.normal(kx, (bz, l, input_dim), dtype=jnp.float32)

    # Deterministic nn.Linear-style init (uniform in +/- 1/sqrt(fan_in)).
    bound = 1.0 / math.sqrt(input_dim)
    weight = jax.random.uniform(
        kw, (output_dim, input_dim), minval=-bound, maxval=bound, dtype=jnp.float32
    )
    bias = jax.random.uniform(
        kb, (output_dim,), minval=-bound, maxval=bound, dtype=jnp.float32
    )

    out = simple_pooling_forward(x, weight, bias, grid_size)
    out = jax.block_until_ready(out)

    ref = simple_pooling_reference(x, weight, bias, grid_size)
    assert out.shape == (bz, grid_size * grid_size, output_dim)
    assert jnp.allclose(out, ref, atol=1e-5, rtol=1e-5)

    print("KERNEL_OK")
</pallas_src>

<mosaic_0001>
module attributes {stable_mosaic.version = 11 : i64} {
  func.func @pooling_proj_kernel(%arg0: i32, %arg1: memref<2x64x128xf32, #tpu.memory_space<vmem>>, %arg2: memref<16x64xf32, #tpu.memory_space<vmem>>, %arg3: memref<128x128xf32, #tpu.memory_space<vmem>>, %arg4: memref<1x128xf32, #tpu.memory_space<vmem>>, %arg5: memref<32x128xf32, #tpu.memory_space<vmem>>, %arg6: memref<32x128xf32, #tpu.memory_space<vmem>>) attributes {dimension_semantics = [#tpu.dimension_semantics<parallel>], iteration_bounds = array<i64: 1>, scalar_prefetch = 0 : i64, scratch_operands = 1 : i64, tpu.core_type = #tpu.core_type<tc>, window_params = [{transform_indices = @transform_0, window_bounds = array<i64: 2, 64, 128>}, {pipeline_mode = #tpu.pipeline_mode<synchronous>, transform_indices = @transform_1, window_bounds = array<i64: 16, 64>}, {pipeline_mode = #tpu.pipeline_mode<synchronous>, transform_indices = @transform_2, window_bounds = array<i64: 128, 128>}, {pipeline_mode = #tpu.pipeline_mode<synchronous>, transform_indices = @transform_3, window_bounds = array<i64: 1, 128>}, {transform_indices = @transform_4, window_bounds = array<i64: 32, 128>}]} {
    %c0 = arith.constant 0 : index
    %c0_0 = arith.constant 0 : index
    %0 = vector.load %arg2[%c0, %c0_0] : memref<16x64xf32, #tpu.memory_space<vmem>>, vector<16x64xf32>
    %c0_1 = arith.constant 0 : index
    %c0_2 = arith.constant 0 : index
    %c0_3 = arith.constant 0 : index
    %1 = vector.load %arg1[%c0_1, %c0_2, %c0_3] : memref<2x64x128xf32, #tpu.memory_space<vmem>>, vector<1x64x128xf32>
    %2 = vector.shape_cast %1 : vector<1x64x128xf32> to vector<64x128xf32>
    %cst = arith.constant dense<0.000000e+00> : vector<16x128xf32>
    %3 = tpu.matmul %0, %2, %cst {dimension_numbers = #tpu.dot_dimension_numbers<[1], [0], [0], [1], [0, 0, 1, 1], [], []>} : vector<16x64xf32>, vector<64x128xf32>, vector<16x128xf32> -> vector<16x128xf32>
    %c0_4 = arith.constant 0 : index
    %c0_5 = arith.constant 0 : index
    %4 = vector.load %arg6[%c0_4, %c0_5] : memref<32x128xf32, #tpu.memory_space<vmem>>, vector<16x128xf32>
    tpu.vector_store %arg6[%c0_4, %c0_5], %3 {strides = array<i32>} : memref<32x128xf32, #tpu.memory_space<vmem>>, vector<16x128xf32>,
    %c1 = arith.constant 1 : index
    %c0_6 = arith.constant 0 : index
    %c0_7 = arith.constant 0 : index
    %5 = vector.load %arg1[%c1, %c0_6, %c0_7] : memref<2x64x128xf32, #tpu.memory_space<vmem>>, vector<1x64x128xf32>
    %6 = vector.shape_cast %5 : vector<1x64x128xf32> to vector<64x128xf32>
    %cst_8 = arith.constant dense<0.000000e+00> : vector<16x128xf32>
    %7 = tpu.matmul %0, %6, %cst_8 {dimension_numbers = #tpu.dot_dimension_numbers<[1], [0], [0], [1], [0, 0, 1, 1], [], []>} : vector<16x64xf32>, vector<64x128xf32>, vector<16x128xf32> -> vector<16x128xf32>
    %c16 = arith.constant 16 : index
    %c0_9 = arith.constant 0 : index
    %8 = vector.load %arg6[%c16, %c0_9] : memref<32x128xf32, #tpu.memory_space<vmem>>, vector<16x128xf32>
    tpu.vector_store %arg6[%c16, %c0_9], %7 {strides = array<i32>} : memref<32x128xf32, #tpu.memory_space<vmem>>, vector<16x128xf32>,
    %c0_10 = arith.constant 0 : index
    %c0_11 = arith.constant 0 : index
    %9 = vector.load %arg6[%c0_10, %c0_11] : memref<32x128xf32, #tpu.memory_space<vmem>>, vector<32x128xf32>
    %c0_12 = arith.constant 0 : index
    %c0_13 = arith.constant 0 : index
    %10 = vector.load %arg3[%c0_12, %c0_13] : memref<128x128xf32, #tpu.memory_space<vmem>>, vector<128x128xf32>
    %cst_14 = arith.constant dense<0.000000e+00> : vector<32x128xf32>
    %11 = tpu.matmul %9, %10, %cst_14 {dimension_numbers = #tpu.dot_dimension_numbers<[1], [0], [0], [1], [0, 0, 1, 1], [], []>} : vector<32x128xf32>, vector<128x128xf32>, vector<32x128xf32> -> vector<32x128xf32>
    %c0_15 = arith.constant 0 : index
    %c0_16 = arith.constant 0 : index
    %12 = vector.load %arg4[%c0_15, %c0_16] : memref<1x128xf32, #tpu.memory_space<vmem>>, vector<1x128xf32>
    %13 = vector.broadcast %12 : vector<1x128xf32> to vector<32x128xf32>
    %14 = arith.addf %11, %13 : vector<32x128xf32>
    %c0_17 = arith.constant 0 : index
    %c0_18 = arith.constant 0 : index
    %15 = vector.load %arg5[%c0_17, %c0_18] : memref<32x128xf32, #tpu.memory_space<vmem>>, vector<32x128xf32>
    tpu.vector_store %arg5[%c0_17, %c0_18], %14 {strides = array<i32>} : memref<32x128xf32, #tpu.memory_space<vmem>>, vector<32x128xf32>,
    return
  }
  func.func @transform_0(%arg0: i32) -> (i32, i32, i32) {
    %c0_i32 = arith.constant 0 : i32
    %c0_i32_0 = arith.constant 0 : i32
    %c0_i32_1 = arith.constant 0 : i32
    return %arg0, %c0_i32, %c0_i32_0 : i32, i32, i32
  }
  func.func @transform_1(%arg0: i32) -> (i32, i32) {
    %c0_i32 = arith.constant 0 : i32
    %c0_i32_0 = arith.constant 0 : i32
    %c0_i32_1 = arith.constant 0 : i32
    return %c0_i32, %c0_i32_0 : i32, i32
  }
  func.func @transform_2(%arg0: i32) -> (i32, i32) {
    %c0_i32 = arith.constant 0 : i32
    %c0_i32_0 = arith.constant 0 : i32
    %c0_i32_1 = arith.constant 0 : i32
    return %c0_i32, %c0_i32_0 : i32, i32
  }
  func.func @transform_3(%arg0: i32) -> (i32, i32) {
    %c0_i32 = arith.constant 0 : i32
    %c0_i32_0 = arith.constant 0 : i32
    %c0_i32_1 = arith.constant 0 : i32
    return %c0_i32, %c0_i32_0 : i32, i32
  }
  func.func @transform_4(%arg0: i32) -> (i32, i32) {
    %c0_i32 = arith.constant 0 : i32
    %c0_i32_0 = arith.constant 0 : i32
    return %arg0, %c0_i32 : i32, i32
  }
}

</mosaic_0001>

<bundles_post_ra>
// kernel: tpu_custom_call.1
= control target key start
LH: loop header
LB: loop body
LE: loop exit
PB: predicated region body
PF: predicated region fallthrough
CT: control target
= control target key end

     0   :  { %9 = vsyncpa [#allocation4], 0  ;;  %s763_s0 = inlined_call_operand.hbm [shape: f32[2,64,128], index: 0, kind: input, shape index: {}]   ;;  %s764_s1 = inlined_call_operand.hbm [shape: f32[16,64], index: 1, kind: input, shape index: {}]   ;;  %s765_s2 = inlined_call_operand.hbm [shape: f32[128,128], index: 2, kind: input, shape index: {}]   ;;  %s766_s3 = inlined_call_operand.vmem [shape: f32[1,128], index: 3, kind: input, shape index: {}]   ;;  %s767_s4 = inlined_call_operand.hbm [shape: f32[32,128], index: 4, kind: output, shape index: {}]  }
   0x1   :  { %10 = vsyncpa [#allocation7], 0 }
   0x2   :  { %11 = vsyncpa [#allocation5], 0  ;;  %s658_s15 = smov [#allocation6]   ;;  %s659_s17 = smov [#allocation3]  }
   0x3   :  { %s29_s16 = sshll.u32 %s658_s15, 4  ;;  %s17_s18 = sshll.u32 %s659_s17, 4  ;;  %s30_s16 = int_to_ptr.vmem [resolvable:$true] %s29_s16  ;;  %s689_s18 = int_to_ptr.vmem [resolvable:$true] %s17_s18 }
   0x4   :  { %s564_s21 = scalar_lea.hbm %s764_s1, 256 }
   0x5   :  { %p565_p0 = scmp.ne.s32.totalorder %s764_s1, %s564_s21  ;;  %p568_p1 = scmp.lt.u32.totalorder %s564_s21, %s764_s1 }
   0x7   :  { %p570_p2 = pnand %p568_p1, %p565_p0 }
   0x9   :  { %573 = shalt.err (!%p570_p2)
}
   0xa   :  { %s574_s26 = scalar_lea.vmem %s30_s16, 256  ;;  %p579_p4 = scmp.lt.s32.totalorder %s30_s16, %s30_s16 }
   0xb   :  { %p575_p3 = scmp.ne.s32.totalorder %s30_s16, %s574_s26  ;;  %p580_p5 = scmp.lt.s32.totalorder %s574_s26, %s574_s26 }
   0xd   :  { %p581_p6 = por %p580_p5, %p579_p4 }
   0xf   :  { %p582_p7 = pnand %p581_p6, %p575_p3 }
  0x11   :  { %585 = shalt.err (!%p582_p7)
}
  0x12   :  { %s660_s27 = smov 128   ;;  %s661_s28 = smov 8  }
  0x13   :  { %35 = dma.hbm_to_vmem [thread:$0]  %s764_s1, 256, %s30_s16, [#allocation7], %s660_s27, %s660_s27, %s661_s28  }
  0x14   :  { %s586_s7 = scalar_lea.hbm %s763_s0, 2048 }
  0x15   :  { %p587_p8 = scmp.ne.s32.totalorder %s763_s0, %s586_s7  ;;  %p590_p9 = scmp.lt.u32.totalorder %s586_s7, %s763_s0 }
  0x17   :  { %p592_p10 = pnand %p590_p9, %p587_p8 }
  0x19   :  { %595 = shalt.err (!%p592_p10)
}
  0x1a   :  { %s596_s12 = scalar_lea.vmem %s689_s18, 2048  ;;  %p601_p12 = scmp.lt.s32.totalorder %s689_s18, %s689_s18 }
  0x1b   :  { %p597_p11 = scmp.ne.s32.totalorder %s689_s18, %s596_s12  ;;  %p602_p13 = scmp.lt.s32.totalorder %s596_s12, %s596_s12 }
  0x1d   :  { %p603_p0 = por %p602_p13, %p601_p12 }
  0x1f   :  { %p604_p1 = pnand %p603_p0, %p597_p11 }
  0x21   :  { %607 = shalt.err (!%p604_p1)
}
  0x22   :  { %23 = dma.hbm_to_vmem [thread:$0]  %s763_s0, 2048, %s689_s18, [#allocation4], %s660_s27, %s660_s27, %s661_s28  }
  0x23   :  { %s662_s14 = smov [#allocation8]   ;;  %s608_s19 = scalar_lea.hbm %s765_s2, 2048 }
  0x24   :  { %s41_s15 = sshll.u32 %s662_s14, 4  ;;  %p609_p2 = scmp.ne.s32.totalorder %s765_s2, %s608_s19  ;;  %s42_s15 = int_to_ptr.vmem [resolvable:$true] %s41_s15 }
  0x25   :  { %p612_p3 = scmp.lt.u32.totalorder %s608_s19, %s765_s2 }
  0x27   :  { %p614_p4 = pnand %p612_p3, %p609_p2 }
  0x29   :  { %617 = shalt.err (!%p614_p4)
}
  0x2a   :  { %s618_s24 = scalar_lea.vmem %s42_s15, 2048  ;;  %p623_p6 = scmp.lt.s32.totalorder %s42_s15, %s42_s15 }
  0x2b   :  { %p619_p5 = scmp.ne.s32.totalorder %s42_s15, %s618_s24  ;;  %p624_p7 = scmp.lt.s32.totalorder %s618_s24, %s618_s24 }
  0x2d   :  { %p625_p8 = por %p624_p7, %p623_p6 }
  0x2f   :  { %p626_p9 = pnand %p625_p8, %p619_p5 }
  0x31   :  { %629 = shalt.err (!%p626_p9)
}
  0x32   :  { %47 = dma.hbm_to_vmem [thread:$0]  %s765_s2, 2048, %s42_s15, [#allocation7], %s660_s27, %s660_s27, %s661_s28  }
  0x33   :  { %652 = dma.done.wait [#allocation4], 2048  }
  0x34   :  { %653 = vsyncadd [#allocation4], 4294965248 }
  0x35   :  { %654 = dma.done.wait [#allocation7], 2304  }
  0x36   :  { %655 = vsyncadd [#allocation7], 4294964992  ;;  %v61_v0 = vld [vmem:[#allocation3] sm:$0xff]  ;;  %v62_v1 = vld [vmem:[#allocation3 + $0x8] sm:$0xff]  ;;  %vm69_vm0 = vcmask 523264   ;;  %s663_s26 = smov [#allocation9]  }
  0x37   :  { %v63_v2 = vld [vmem:[#allocation3 + $0x10] sm:$0xff]  ;;  %v494_v3 = vpack.c.bf16 %v62_v1, %v61_v0  ;;  %v64_v4 = vld [vmem:[#allocation3 + $0x18] sm:$0xff]  ;;  %v65_v6 = vld [vmem:[#allocation3 + $0x20] sm:$0xff]  ;;  %s360_s29 = sshll.u32 %s663_s26, 4  ;;  %s361_s29 = int_to_ptr.vmem [resolvable:$true] %s360_s29 }
  0x38   :  { %v498_v5 = vpack.c.bf16 %v64_v4, %v63_v2  ;;  %v66_v7 = vld [vmem:[#allocation3 + $0x28] sm:$0xff]  ;;  %v59_v8 = vld [vmem:[#allocation6] sm:$0xff]  ;;  %v67_v10 = vld [vmem:[#allocation3 + $0x30] sm:$0xff]  ;;  %s630_s30 = scalar_lea.vmem %s361_s29, 512  ;;  %p635_p11 = scmp.lt.s32.totalorder %s361_s29, %s361_s29 }
  0x39   :  { %495 = vmatprep.subr.bf16.mxu1 %v494_v3  ;;  %434 = vmatprep.mubr.msk.f32.mxu1 %vm69_vm0, %v59_v8  ;;  %v502_v9 = vpack.c.bf16 %v66_v7, %v65_v6  ;;  %v68_v11 = vld [vmem:[#allocation3 + $0x38] sm:$0xff]  ;;  %v243_v12 = vld [vmem:[#allocation8] sm:$0xff]  ;;  %v245_v14 = vld [vmem:[#allocation8 + $0x10] sm:$0xff]  ;;  %p631_p10 = scmp.ne.s32.totalorder %s361_s29, %s630_s30  ;;  %p636_p12 = scmp.lt.s32.totalorder %s630_s30, %s630_s30 }
  0x3a   :  { %497 = vmatpush3.bf16.msra.mxu1 %v494_v3  ;;  %v244_v13 = vld [vmem:[#allocation8 + $0x8] sm:$0xff]  ;;  %v246_v16 = vld [vmem:[#allocation8 + $0x18] sm:$0xff]  ;;  %v247_v18 = vld [vmem:[#allocation8 + $0x20] sm:$0xff]  ;;  %v506_v20 = vpack.c.bf16 %v68_v11, %v67_v10 }
  0x3b   :  { %499 = vmatprep.subr.bf16.mxu1 %v498_v5  ;;  %v526_v15 = vpack.c.bf16 %v244_v13, %v243_v12  ;;  %v530_v17 = vpack.c.bf16 %v246_v16, %v245_v14  ;;  %v248_v19 = vld [vmem:[#allocation8 + $0x28] sm:$0xff]  ;;  %v154_v21 = vld [vmem:[#allocation3 + $0x40] sm:$0xff]  ;;  %v155_v22 = vld [vmem:[#allocation3 + $0x48] sm:$0xff]  ;;  %p637_p13 = por %p636_p12, %p635_p11 }
  0x3c   :  { %v534_v23 = vpack.c.bf16 %v248_v19, %v247_v18  ;;  %v249_v24 = vld [vmem:[#allocation8 + $0x30] sm:$0xff]  ;;  %v250_v25 = vld [vmem:[#allocation8 + $0x38] sm:$0xff]  ;;  %v510_v26 = vpack.c.bf16 %v155_v22, %v154_v21  ;;  %v156_v27 = vld [vmem:[#allocation3 + $0x50] sm:$0xff] }
  0x3d   :  { %527 = vmatprep.subr.bf16.mxu0 %v526_v15  ;;  %v157_v28 = vld [vmem:[#allocation3 + $0x58] sm:$0xff]  ;;  %v538_v29 = vpack.c.bf16 %v250_v25, %v249_v24  ;;  %v60_v30 = vld [vmem:[#allocation6 + $0x8] sm:$0xff]  ;;  %v251_v31 = vld [vmem:[#allocation8 + $0x40] sm:$0xff]  ;;  %p638_p0 = pnand %p637_p13, %p631_p10 }
  0x3e   :  { %501 = vmatpush3.bf16.msra.mxu1 %v498_v5  ;;  %529 = vmatpush3.bf16.msra.mxu0 %v526_v15  ;;  %v252_v32 = vld [vmem:[#allocation8 + $0x48] sm:$0xff]  ;;  %v514_v33 = vpack.c.bf16 %v157_v28, %v156_v27  ;;  %v158_v34 = vld [vmem:[#allocation3 + $0x60] sm:$0xff]  ;;  %v159_v35 = vld [vmem:[#allocation3 + $0x68] sm:$0xff] }
  0x3f   :  { %503 = vmatprep.subr.bf16.mxu1 %v502_v9  ;;  %531 = vmatprep.subr.bf16.mxu0 %v530_v17  ;;  %v542_v36 = vpack.c.bf16 %v252_v32, %v251_v31  ;;  %v253_v37 = vld [vmem:[#allocation8 + $0x50] sm:$0xff]  ;;  %v254_v38 = vld [vmem:[#allocation8 + $0x58] sm:$0xff]  ;;  %v518_v39 = vpack.c.bf16 %v159_v35, %v158_v34  ;;  %v160_v40 = vld [vmem:[#allocation3 + $0x70] sm:$0xff] }
  0x40   :  { %v161_v41 = vld [vmem:[#allocation3 + $0x78] sm:$0xff]  ;;  %v546_v42 = vpack.c.bf16 %v254_v38, %v253_v37  ;;  %v255_v43 = vld [vmem:[#allocation8 + $0x60] sm:$0xff]  ;;  %v257_v47 = vld [vmem:[#allocation8 + $0x70] sm:$0xff] }
  0x41   :  { %v256_v44 = vld [vmem:[#allocation8 + $0x68] sm:$0xff]  ;;  %v522_v45 = vpack.c.bf16 %v161_v41, %v160_v40  ;;  %v258_v48 = vld [vmem:[#allocation8 + $0x78] sm:$0xff]  ;;  %v377_v54 = vld [vmem:[%s766_s3] ss:$0 sm:$0xff] }
  0x42   :  { %505 = vmatpush3.bf16.msra.mxu1 %v502_v9  ;;  %533 = vmatpush3.bf16.msra.mxu0 %v530_v17  ;;  %v550_v46 = vpack.c.bf16 %v256_v44, %v255_v43  ;;  %v554_v49 = vpack.c.bf16 %v258_v48, %v257_v47 }
  0x43   :  { %507 = vmatprep.subr.bf16.mxu1 %v506_v20  ;;  %535 = vmatprep.subr.bf16.mxu0 %v534_v23 }
  0x46   :  { %509 = vmatpush3.bf16.msra.mxu1 %v506_v20  ;;  %537 = vmatpush3.bf16.msra.mxu0 %v534_v23 }
  0x47   :  { %511 = vmatprep.subr.bf16.mxu1 %v510_v26  ;;  %539 = vmatprep.subr.bf16.mxu0 %v538_v29 }
  0x49   :  { %435 = vmatmul.mubr.msk.f32.vlgmr.msra.gmra.mrb[0].mxu1 %vm69_vm0, %v60_v30 }
  0x4a   :  { %513 = vmatpush3.bf16.msra.mxu1 %v510_v26  ;;  %453 = vmatprep.mubr.msk.f32.mxu1 %vm69_vm0, %v59_v8 }
  0x4b   :  { %515 = vmatprep.subr.bf16.mxu1 %v514_v33  ;;  %541 = vmatpush3.bf16.msra.mxu0 %v538_v29 }
  0x4c   :  { %543 = vmatprep.subr.bf16.mxu0 %v542_v36 }
  0x4e   :  { %517 = vmatpush3.bf16.msra.mxu1 %v514_v33 }
  0x4f   :  { %519 = vmatprep.subr.bf16.mxu1 %v518_v39  ;;  %545 = vmatpush3.bf16.msra.mxu0 %v542_v36 }
  0x50   :  { %547 = vmatprep.subr.bf16.mxu0 %v546_v42 }
  0x52   :  { %521 = vmatpush3.bf16.msra.mxu1 %v518_v39 }
  0x53   :  { %523 = vmatprep.subr.bf16.mxu1 %v522_v45  ;;  %549 = vmatpush3.bf16.msra.mxu0 %v546_v42 }
  0x54   :  { %551 = vmatprep.subr.bf16.mxu0 %v550_v46 }
  0x56   :  { %525 = vmatpush3.bf16.msra.mxu1 %v522_v45 }
  0x57   :  { %553 = vmatpush3.bf16.msra.mxu0 %v550_v46 }
  0x58   :  { %555 = vmatprep.subr.bf16.mxu0 %v554_v49 }
  0x59   :  { %454 = vmatmul.mubr.msk.f32.vlgmr.msra.gmra.mrb[2].mxu1 %vm69_vm0, %v60_v30 }
  0x5b   :  { %557 = vmatpush3.bf16.msra.mxu0 %v554_v49 }
 0x11c   :  { %v436_v50 = vpop.f32.mrb[0].mxu1 }
 0x11d   :  { %v142_v51 = vpop.f32.mrb[1].mxu1 }
 0x11e   :  { %488 = vmatprep.mubr.f32.mxu0 %v142_v51 }
 0x11f   :  { %489 = vmatmul.mubr.f32.vlgmr.msra.gmra.mrb[0].mxu0 %v436_v50 }
 0x12c   :  { %v455_v52 = vpop.f32.mrb[2].mxu1 }
 0x12d   :  { %v228_v53 = vpop.f32.mrb[3].mxu1 }
 0x12e   :  { %491 = vmatprep.mubr.f32.mxu0 %v228_v53 }
 0x12f   :  { %492 = vmatmul.mubr.f32.gmra.mrb[2].mxu0 %v455_v52 }
 0x1f2   :  { %v490_v55 = vpop.f32.mrb[0].mxu0 }
 0x1f3   :  { %v338_v56 = vadd.f32 %v490_v55, %v377_v54  ;;  %v332_v57 = vpop.f32.mrb[1].mxu0 }
 0x1f4   :  { %v333_v58 = vadd.f32 %v377_v54, %v332_v57 }
 0x1f5   :  { %352 = vst [vmem:[#allocation9 + $0x8] sm:$0xff] %v338_v56 }
 0x1f6   :  { %351 = vst [vmem:[#allocation9] sm:$0xff] %v333_v58 }
 0x202   :  { %v493_v59 = vpop.f32.mrb[2].mxu0 }
 0x203   :  { %v348_v60 = vadd.f32 %v493_v59, %v377_v54  ;;  %v342_v61 = vpop.f32.mrb[3].mxu0 }
 0x204   :  { %v343_v62 = vadd.f32 %v377_v54, %v342_v61 }
 0x205   :  { %354 = vst [vmem:[#allocation9 + $0x18] sm:$0xff] %v348_v60 }
 0x206   :  { %353 = vst [vmem:[#allocation9 + $0x10] sm:$0xff] %v343_v62 }
 0x207   :  { %641 = shalt.err (!%p638_p0)
}
 0x208   :  { %s642_s6 = scalar_lea.hbm %s767_s4, 512 }
 0x209   :  { %p643_p1 = scmp.ne.s32.totalorder %s767_s4, %s642_s6  ;;  %p646_p2 = scmp.lt.u32.totalorder %s642_s6, %s767_s4 }
 0x20b   :  { %p648_p3 = pnand %p646_p2, %p643_p1 }
 0x20d   :  { %651 = shalt.err (!%p648_p3)
}
 0x20e   :  { %366 = dma.vmem_to_hbm [thread:$0]  %s361_s29, 512, %s767_s4, [#allocation5], %s660_s27, %s660_s27, %s661_s28  }
 0x20f   :  { %656 = dma.done.wait [#allocation5], 512  }
 0x210   :  { %657 = vsyncadd [#allocation5], 4294966784 }
 0x211   :  { %370 = vsyncpa [#allocation4], 1 }
 0x212   :  { %371 = vsyncpa [#allocation7], 1 }
 0x213   :  { %372 = vsyncpa [#allocation5], 1 }

</bundles_post_ra>
